<compile_context>
chip_gen: v5e
topology: v5e:2x2
jax: 0.10.0
libtpu: 0.0.40
codegen_flags: <defaults>
</compile_context>

<pallas_src>
import math
import functools

import jax
import jax.numpy as jnp
import numpy as np
from jax.experimental import pallas as pl
from jax.experimental.pallas import tpu as pltpu


def _round_up(x, n):
    return ((x + n - 1) // n) * n


def _margin_matmul_kernel(emb_ref, w_ref, lab_ref, ctm_ref, fts_ref, t_ref,
                          out_ref, *, s):
    """One (TM, TN) output tile of the CurricularFace training logits.

    emb_ref : (TM, D)  f32   pre-normalized embeddings (pass 1)
    w_ref   : (D, TN)  f32   raw classifier weight tile (normalized here)
    lab_ref : (TM, 1)  i32   integer class label per row
    ctm_ref : (TM, 1)  f32   cos(theta + m) for the target logit (pass 1)
    fts_ref : (TM, 1)  f32   final target logit * s (pass 1)
    t_ref   : (1, 1)   f32   updated `t` EMA value (SMEM)
    out_ref : (TM, TN) f32   scaled logits
    """
    j = pl.program_id(1)
    tn = out_ref.shape[1]

    # Per-tile column normalization of the weight (sublane reduce over D).
    w = w_ref[...].astype(jnp.float32)                       # (D, TN)
    nsq = jnp.sum(w * w, axis=0, keepdims=True)              # (1, TN)
    w_n = (w * jax.lax.rsqrt(jnp.maximum(nsq, 1e-30))).astype(jnp.bfloat16)

    # bf16 MXU matmul, f32 accumulation.
    emb = emb_ref[...].astype(jnp.bfloat16)                  # (TM, D)
    cos = jnp.dot(emb, w_n, preferred_element_type=jnp.float32)
    cos = jnp.clip(cos, -1.0, 1.0)                           # (TM, TN)

    # Fused epilogue: scatter of final target logit + hard-example reweighting
    # + scale by s, in one pass over the tile.
    col = jax.lax.broadcasted_iota(jnp.int32, cos.shape, 1) + j * tn
    tgt_mask = col == lab_ref[...]                           # (TM, TN)
    hard_mask = cos > ctm_ref[...]                           # (TM, TN)
    t_val = t_ref[0, 0]
    sc = cos * s
    out_ref[...] = jnp.where(tgt_mask, fts_ref[...],
                             jnp.where(hard_mask, sc * (t_val + cos), sc))


def _prologue(embeddings, labels, weight, t, *, s, cos_m, sin_m, th, mm):
    """Pass 1: target-logit path + `t` EMA (touches only B weight columns)."""
    emb32 = embeddings.astype(jnp.float32)
    emb_n = emb32 * jax.lax.rsqrt(jnp.sum(emb32 * emb32, axis=1, keepdims=True))

    w32 = weight.astype(jnp.float32)
    w_cols = jnp.take(w32, labels, axis=1).T                       # (B, D)
    w_cols_n = w_cols * jax.lax.rsqrt(
        jnp.sum(w_cols * w_cols, axis=1, keepdims=True))

    target_logit = jnp.clip(
        jnp.sum(emb_n * w_cols_n, axis=1, keepdims=True), -1.0, 1.0)  # (B, 1)
    sin_theta = jnp.sqrt(jnp.maximum(1.0 - target_logit * target_logit, 0.0))
    cos_theta_m = target_logit * cos_m - sin_theta * sin_m
    final_target = jnp.where(target_logit > th, cos_theta_m, target_logit - mm)

    # t <- mean(target_logit) * 0.01 + 0.99 * t   (updated BEFORE being used)
    t_new = jnp.mean(target_logit) * 0.01 + 0.99 * t.reshape(())

    return emb_n, cos_theta_m, final_target * s, t_new


def curricular_face_forward(embeddings, labels, weight, t, *, s, m,
                            tm=256, tn=512):
    """Training-mode forward of CurricularFace.

    embeddings : (B, D) float
    labels     : (B,)   int32 class indices (argmax of the one-hot input)
    weight     : (D, C) float classifier kernel
    t          : (1,)   float EMA buffer
    Returns (logits (B, C) f32, updated_t (1,) f32).
    """
    cos_m = math.cos(m)
    sin_m = math.sin(m)
    th = math.cos(math.pi - m)
    mm = math.sin(math.pi - m) * m

    B, D = embeddings.shape
    C = weight.shape[1]

    emb_n, ctm, fts, t_new = _prologue(
        embeddings, labels, weight, t,
        s=s, cos_m=cos_m, sin_m=sin_m, th=th, mm=mm)

    # --- tile sizes (multiples of (8, 128); pad B/C up to the tiles) ---------
    tm_eff = max(8, min(_round_up(int(tm), 8), _round_up(B, 8)))
    tn_eff = max(128, min(_round_up(int(tn), 128), _round_up(C, 128)))
    bp = _round_up(B, tm_eff)
    cp = _round_up(C, tn_eff)

    emb_p = jnp.pad(emb_n, ((0, bp - B), (0, 0)))
    w_p = jnp.pad(weight.astype(jnp.float32), ((0, 0), (0, cp - C)))
    lab_p = jnp.pad(labels.astype(jnp.int32).reshape(B, 1), ((0, bp - B), (0, 0)))
    ctm_p = jnp.pad(ctm, ((0, bp - B), (0, 0)))
    fts_p = jnp.pad(fts, ((0, bp - B), (0, 0)))
    t_arr = t_new.astype(jnp.float32).reshape(1, 1)

    grid = (bp // tm_eff, cp // tn_eff)
    kernel = functools.partial(_margin_matmul_kernel, s=float(s))

    out_p = pl.pallas_call(
        kernel,
        out_shape=jax.ShapeDtypeStruct((bp, cp), jnp.float32),
        grid=grid,
        in_specs=[
            pl.BlockSpec((tm_eff, D), lambda i, j: (i, 0)),   # emb_n (pass 1)
            pl.BlockSpec((D, tn_eff), lambda i, j: (0, j)),   # weight tile
            pl.BlockSpec((tm_eff, 1), lambda i, j: (i, 0)),   # labels
            pl.BlockSpec((tm_eff, 1), lambda i, j: (i, 0)),   # cos_theta_m
            pl.BlockSpec((tm_eff, 1), lambda i, j: (i, 0)),   # final_target * s
            pl.BlockSpec(memory_space=pltpu.MemorySpace.SMEM),  # updated t
        ],
        out_specs=pl.BlockSpec((tm_eff, tn_eff), lambda i, j: (i, j)),
        compiler_params=pltpu.CompilerParams(
            dimension_semantics=("parallel", "parallel")),
    )(emb_p, w_p, lab_p, ctm_p, fts_p, t_arr)

    return out_p[:B, :C], t_new.reshape(1)


def _reference(embeddings, labels, weight, t, *, s, m):
    """Pure-JAX reference (PyTorch semantics, bf16 MXU matmul like the kernel)."""
    cos_m, sin_m = math.cos(m), math.sin(m)
    th, mm = math.cos(math.pi - m), math.sin(math.pi - m) * m
    e32 = embeddings.astype(jnp.float32)
    e = e32 / jnp.linalg.norm(e32, axis=1, keepdims=True)
    w32 = weight.astype(jnp.float32)
    w = w32 / jnp.linalg.norm(w32, axis=0, keepdims=True)
    cos = jnp.clip(jnp.dot(e.astype(jnp.bfloat16), w.astype(jnp.bfloat16),
                           preferred_element_type=jnp.float32), -1.0, 1.0)
    tgt = jnp.clip(jnp.sum(e * w[:, labels].T, axis=1, keepdims=True), -1.0, 1.0)
    sin = jnp.sqrt(jnp.maximum(1.0 - tgt ** 2, 0.0))
    ctm = tgt * cos_m - sin * sin_m
    mask = cos > ctm
    ftl = jnp.where(tgt > th, ctm, tgt - mm)
    t_new = jnp.mean(tgt) * 0.01 + 0.99 * t[0]
    cos = jnp.where(mask, cos * (t_new + cos), cos)
    cos = cos.at[jnp.arange(cos.shape[0]), labels].set(ftl[:, 0])
    return cos * s, t_new


# TODO(synk): step()/set_params() schedule, eval-mode branches and parameter
# init are host-side module bookkeeping, not kernel work; only the training
# forward is implemented here.

if __name__ == "__main__":
    B, D, C = 16, 32, 512          # batch, in_features, out_features (small)
    s_param, m_param = 64.0, 0.5   # first entry of `params` (set_params)

    key = jax.random.PRNGKey(0)
    k_emb, k_w, k_lab = jax.random.split(key, 3)

    embeddings = jax.random.normal(k_emb, (B, D), dtype=jnp.float32)
    # nn.init.normal_(self.kernel, std=0.01)
    weight = 0.01 * jax.random.normal(k_w, (D, C), dtype=jnp.float32)
    labels_int = jax.random.randint(k_lab, (B,), 0, C, dtype=jnp.int32)
    # The PyTorch module receives one-hot labels and argmaxes them; we do the
    # argmax outside the kernel (integer labels only, no (B, C) one-hot load).
    label_onehot = jax.nn.one_hot(labels_int, C, dtype=jnp.float32)
    labels = jnp.argmax(label_onehot, axis=1).astype(jnp.int32)
    t_buf = jnp.zeros((1,), dtype=jnp.float32)   # register_buffer('t', zeros(1))

    # Small tiles so the (B-tile, C-tile) grid is actually exercised: (2, 4).
    out, t_new = curricular_face_forward(embeddings, labels, weight, t_buf,
                                         s=s_param, m=m_param, tm=8, tn=128)
    jax.block_until_ready(out)
    jax.block_until_ready(t_new)

    ref_out, ref_t = _reference(embeddings, labels, weight, t_buf,
                                s=s_param, m=m_param)
    np.testing.assert_allclose(np.asarray(out), np.asarray(ref_out),
                               rtol=1e-4, atol=2e-3)
    np.testing.assert_allclose(np.asarray(t_new)[0], np.asarray(ref_t),
                               rtol=1e-5, atol=1e-6)

    print("KERNEL_OK")
</pallas_src>

<mosaic_0001>
module attributes {stable_mosaic.version = 11 : i64} {
  func.func @_margin_matmul_kernel(%arg0: i32, %arg1: i32, %arg2: memref<8x32xf32, #tpu.memory_space<vmem>>, %arg3: memref<32x128xf32, #tpu.memory_space<vmem>>, %arg4: memref<8x1xi32, #tpu.memory_space<vmem>>, %arg5: memref<8x1xf32, #tpu.memory_space<vmem>>, %arg6: memref<8x1xf32, #tpu.memory_space<vmem>>, %arg7: memref<1x1xf32, #tpu.memory_space<smem>>, %arg8: memref<8x128xf32, #tpu.memory_space<vmem>>) attributes {dimension_semantics = [#tpu.dimension_semantics<parallel>, #tpu.dimension_semantics<parallel>], iteration_bounds = array<i64: 2, 4>, scalar_prefetch = 0 : i64, scratch_operands = 0 : i64, tpu.core_type = #tpu.core_type<tc>, window_params = [{transform_indices = @transform_0, window_bounds = array<i64: 8, 32>}, {transform_indices = @transform_1, window_bounds = array<i64: 32, 128>}, {transform_indices = @transform_2, window_bounds = array<i64: 8, 1>}, {transform_indices = @transform_3, window_bounds = array<i64: 8, 1>}, {transform_indices = @transform_4, window_bounds = array<i64: 8, 1>}, {transform_indices = @transform_5, window_bounds = array<i64: 1, 1>}, {transform_indices = @transform_6, window_bounds = array<i64: 8, 128>}]} {
    %c0 = arith.constant 0 : index
    %c0_0 = arith.constant 0 : index
    %0 = vector.load %arg3[%c0, %c0_0] : memref<32x128xf32, #tpu.memory_space<vmem>>, vector<32x128xf32>
    %1 = arith.mulf %0, %0 : vector<32x128xf32>
    %cst = arith.constant dense<0.000000e+00> : vector<128xf32>
    %2 = vector.multi_reduction <add>, %1, %cst [0] : vector<32x128xf32> to vector<128xf32>
    %3 = vector.shape_cast %2 : vector<128xf32> to vector<1x128xf32>
    %cst_1 = arith.constant 1.000000e-30 : f32
    %4 = vector.broadcast %cst_1 : f32 to vector<1x128xf32>
    %5 = arith.maximumf %3, %4 : vector<1x128xf32>
    %6 = math.rsqrt %5 : vector<1x128xf32>
    %7 = vector.broadcast %6 : vector<1x128xf32> to vector<32x128xf32>
    %8 = arith.mulf %0, %7 : vector<32x128xf32>
    %9 = arith.truncf %8 : vector<32x128xf32> to vector<32x128xbf16>
    %c0_2 = arith.constant 0 : index
    %c0_3 = arith.constant 0 : index
    %10 = vector.load %arg2[%c0_2, %c0_3] : memref<8x32xf32, #tpu.memory_space<vmem>>, vector<8x32xf32>
    %11 = arith.truncf %10 : vector<8x32xf32> to vector<8x32xbf16>
    %cst_4 = arith.constant dense<0.000000e+00> : vector<8x128xf32>
    %12 = tpu.matmul %11, %9, %cst_4 {dimension_numbers = #tpu.dot_dimension_numbers<[1], [0], [0], [1], [0, 0, 1, 1], [], []>} : vector<8x32xbf16>, vector<32x128xbf16>, vector<8x128xf32> -> vector<8x128xf32>
    %cst_5 = arith.constant -1.000000e+00 : f32
    %cst_6 = arith.constant 1.000000e+00 : f32
    %13 = vector.broadcast %cst_5 : f32 to vector<8x128xf32>
    %14 = arith.maximumf %13, %12 : vector<8x128xf32>
    %15 = vector.broadcast %cst_6 : f32 to vector<8x128xf32>
    %16 = arith.minimumf %15, %14 : vector<8x128xf32>
    %17 = tpu.iota {dimensions = array<i32: 1>} : vector<8x128xi32>
    %c128_i32 = arith.constant 128 : i32
    %18 = arith.muli %arg1, %c128_i32 : i32
    %19 = vector.broadcast %18 : i32 to vector<8x128xi32>
    %20 = arith.addi %17, %19 : vector<8x128xi32>
    %c0_7 = arith.constant 0 : index
    %c0_8 = arith.constant 0 : index
    %21 = vector.load %arg4[%c0_7, %c0_8] : memref<8x1xi32, #tpu.memory_space<vmem>>, vector<8x1xi32>
    %22 = vector.broadcast %21 : vector<8x1xi32> to vector<8x128xi32>
    %23 = arith.cmpi eq, %20, %22 : vector<8x128xi32>
    %c0_9 = arith.constant 0 : index
    %c0_10 = arith.constant 0 : index
    %24 = vector.load %arg5[%c0_9, %c0_10] : memref<8x1xf32, #tpu.memory_space<vmem>>, vector<8x1xf32>
    %25 = vector.broadcast %24 : vector<8x1xf32> to vector<8x128xf32>
    %26 = arith.cmpf ogt, %16, %25 : vector<8x128xf32>
    %c0_11 = arith.constant 0 : index
    %c0_12 = arith.constant 0 : index
    %27 = memref.load %arg7[%c0_11, %c0_12] : memref<1x1xf32, #tpu.memory_space<smem>>
    %cst_13 = arith.constant 6.400000e+01 : f32
    %28 = vector.broadcast %cst_13 : f32 to vector<8x128xf32>
    %29 = arith.mulf %16, %28 : vector<8x128xf32>
    %c0_14 = arith.constant 0 : index
    %c0_15 = arith.constant 0 : index
    %30 = vector.load %arg6[%c0_14, %c0_15] : memref<8x1xf32, #tpu.memory_space<vmem>>, vector<8x1xf32>
    %31 = vector.broadcast %27 : f32 to vector<8x128xf32>
    %32 = arith.addf %31, %16 : vector<8x128xf32>
    %33 = arith.mulf %29, %32 : vector<8x128xf32>
    %34 = arith.select %26, %33, %29 : vector<8x128xi1>, vector<8x128xf32>
    %35 = vector.shape_cast %30 : vector<8x1xf32> to vector<8x1xf32>
    %36 = vector.broadcast %35 : vector<8x1xf32> to vector<8x128xf32>
    %37 = arith.select %23, %36, %34 : vector<8x128xi1>, vector<8x128xf32>
    %c0_16 = arith.constant 0 : index
    %c0_17 = arith.constant 0 : index
    %38 = vector.load %arg8[%c0_16, %c0_17] : memref<8x128xf32, #tpu.memory_space<vmem>>, vector<8x128xf32>
    tpu.vector_store %arg8[%c0_16, %c0_17], %37 {strides = array<i32>} : memref<8x128xf32, #tpu.memory_space<vmem>>, vector<8x128xf32>,
    return
  }
  func.func @transform_0(%arg0: i32, %arg1: i32) -> (i32, i32) {
    %c0_i32 = arith.constant 0 : i32
    %c0_i32_0 = arith.constant 0 : i32
    return %arg0, %c0_i32 : i32, i32
  }
  func.func @transform_1(%arg0: i32, %arg1: i32) -> (i32, i32) {
    %c0_i32 = arith.constant 0 : i32
    %c0_i32_0 = arith.constant 0 : i32
    return %c0_i32, %arg1 : i32, i32
  }
  func.func @transform_2(%arg0: i32, %arg1: i32) -> (i32, i32) {
    %c0_i32 = arith.constant 0 : i32
    %c0_i32_0 = arith.constant 0 : i32
    return %arg0, %c0_i32 : i32, i32
  }
  func.func @transform_3(%arg0: i32, %arg1: i32) -> (i32, i32) {
    %c0_i32 = arith.constant 0 : i32
    %c0_i32_0 = arith.constant 0 : i32
    return %arg0, %c0_i32 : i32, i32
  }
  func.func @transform_4(%arg0: i32, %arg1: i32) -> (i32, i32) {
    %c0_i32 = arith.constant 0 : i32
    %c0_i32_0 = arith.constant 0 : i32
    return %arg0, %c0_i32 : i32, i32
  }
  func.func @transform_5(%arg0: i32, %arg1: i32) -> (i32, i32) {
    %c0_i32 = arith.constant 0 : i32
    %c0_i32_0 = arith.constant 0 : i32
    %c0_i32_1 = arith.constant 0 : i32
    return %c0_i32, %c0_i32_0 : i32, i32
  }
  func.func @transform_6(%arg0: i32, %arg1: i32) -> (i32, i32) {
    %c0_i32 = arith.constant 0 : i32
    return %arg0, %arg1 : i32, i32
  }
}

</mosaic_0001>

<bundles_post_ra>
// kernel: tpu_custom_call.1
= control target key start
LH: loop header
LB: loop body
LE: loop exit
PB: predicated region body
PF: predicated region fallthrough
CT: control target
= control target key end

     0   :  { %s1104_s0 = inlined_call_operand.vmem [shape: f32[16,32], index: 0, kind: input, shape index: {}]   ;;  %s1105_s1 = inlined_call_operand.hbm [shape: f32[32,512], index: 1, kind: input, shape index: {}]   ;;  %s1106_s2 = inlined_call_operand.vmem [shape: s32[16,1], index: 2, kind: input, shape index: {}]   ;;  %s1107_s3 = inlined_call_operand.vmem [shape: f32[16,1], index: 3, kind: input, shape index: {}]   ;;  %s1108_s4 = inlined_call_operand.vmem [shape: f32[16,1], index: 4, kind: input, shape index: {}]   ;;  %s1109_s5 = inlined_call_operand.<no memory space> [shape: f32[1,1], index: 5, kind: input, shape index: {}]   ;;  %s1110_s6 = inlined_call_operand.hbm [shape: f32[16,512], index: 6, kind: output, shape index: {}]  }
   0x1   :  { %11 = sst [smem:[#allocation2]] %s1109_s5 }
   0x2   :  { %12 = vsyncpa [#allocation4], 0 }
   0x3   :  { %14 = vsyncpa [#allocation4 + $0x1], 0 }
   0x4   :  { %15 = vsyncpa [#allocation5], 0 }
   0x5   :  { %17 = vsyncpa [#allocation5 + $0x1], 0  ;;  %s917_s23 = smov 0   ;;  %s919_s24 = smov 0  }
   0x6   :  { %s921_s25 = smov 0   ;;  %s923_s26 = smov 0  }
   0x7   :  { %s925_s27 = smov 0   ;;  %s927_s28 = smov 0  }
   0x8   :  { %s929_s29 = smov 0   ;;  %s931_s30 = smov 0  }
   0x9   :  { %s933_s5 = smov 0   ;;  %s935_s7 = smov 0  }
   0xa   :  { %s937_s8 = smov 0  }
   0xb LB: > { %1115 = sst [smem:[#allocation9_spill]] %s841_s25  ;;  %s590_s9 = sadd.s32 4294967295, %s873_s8   ;;  %s873_s8 = sphi %s937_s8, %s23_s8   ;;  %s869_s7 = sphi %s935_s7, %s1138_s7   ;;  %s865_s5 = sphi %s933_s5, %s1137_s5   ;;  %s861_s30 = sphi %s931_s30, %s1128_s30   ;;  %s857_s29 = sphi %s929_s29, %s1136_s29   ;;  %s853_s28 = sphi %s927_s28, %s1135_s28   ;;  %s849_s27 = sphi %s925_s27, %s1134_s27   ;;  %s845_s26 = sphi %s923_s26, %s1133_s26   ;;  %s841_s25 = sphi %s921_s25, %s1126_s25   ;;  %s837_s24 = sphi %s919_s24, %s1132_s24   ;;  %s833_s23 = sphi %s917_s23, %s1131_s23  }
   0xc   : > { %1116 = sst [smem:[#allocation10_spill]] %s869_s7  ;;  %s591_s10 = sadd.s32 4294967294, %s873_s8  }
   0xd   : > { %s32_s11 = sadd.s32 1, %s865_s5  ;;  %s35_s12 = sadd.s32 1, %s869_s7 }
   0xe   : > { %p33_p0 = scmp.ge.s32.totalorder %s32_s11, 4  ;;  %s68_s13 = sadd.s32 1, %s853_s28 }
   0xf   : > { %p75_p1 = scmp.ne.s32.totalorder %s853_s28, %s849_s27  ;;  %p76_p2 = scmp.eq.s32.totalorder %s873_s8, 0 }
  0x10   : > { %s1140_s11 = smov (%p33_p0, %s32_s11), 0  ;;  %s1142_s12 = smov (!%p33_p0, %s35_s12), %s869_s7 }
  0x11   : > { %1117 = sst [smem:[#allocation11_spill]] %s1140_s11  ;;  %s65_s14 = ssub.s32 %s865_s5, %s1140_s11 }
  0x12   : > { %p983_p3 = por %p76_p2, %p75_p1  ;;  %p37_p4 = scmp.ge.s32.totalorder %s1142_s12, 2 }
  0x13   : > { %p66_p5 = scmp.eq.s32.totalorder %s65_s14, 0  ;;  %p81_p6 = scmp.ne.s32.totalorder %s849_s27, %s845_s26 }
  0x14   : > { %p82_p7 = scmp.eq.s32.totalorder %s590_s9, 0  ;;  %s1144_s12 = smov (%p37_p4, %s1142_s12), 0 }
  0x15   : > { %1119 = sst [smem:[#allocation12_spill]] %s1144_s12  ;;  %s190_s18 = ssub.s32 %s869_s7, %s1144_s12 }
  0x16   : > { %s991_s16 = scalar_select %p66_p5, %s853_s28, %s68_s13  }
  0x17   : > { %p993_p8 = por %p82_p7, %p81_p6  ;;  %s192_s19 = sor.u32 %s190_s18, %s65_s14 }
  0x18   : > { %1120 = sst [smem:[#allocation13_spill]] %s991_s16  ;;  %s195_s20 = sadd.s32 1, %s841_s25 }
  0x19   : > { %p193_p9 = scmp.eq.s32.totalorder %s192_s19, 0  ;;  %p205_p10 = scmp.ne.s32.totalorder %s841_s25, %s837_s24 }
  0x1a   : > { %p206_p11 = scmp.eq.s32.totalorder %s590_s9, 7  ;;  %p211_p12 = scmp.ne.s32.totalorder %s837_s24, %s833_s23 }
  0x1b   : > { %s1005_s21 = scalar_select %p193_p9, %s841_s25, %s195_s20  }
  0x1c   : > { %p1007_p13 = por %p206_p11, %p205_p10  ;;  %p212_p0 = scmp.eq.s32.totalorder %s591_s10, 7 }
  0x1d   : > { %1122 = sst [smem:[#allocation14_spill]] %s1005_s21  ;;  %p623_p1 = scmp.lt.s32.totalorder %s873_s8, 8 }
  0x1e   : > { %p1012_p2 = por %p212_p0, %p211_p12  ;;  %s242_s13 = sand.u32 1, %s853_s28  }
  0x1f   : > { %s594_s14 = sshll.u32 %s242_s13, 5  ;;  %s595_s18 = sshll.u32 %s865_s5, 3 }
  0x20   : > { %s250_s20 = scalar_lea.hbm %s1105_s1, %s595_s18  ;;  %s246_s12 = scalar_lea.vmem [#allocation3], %s594_s14 }
  0x21   : > { %s253_s11 = sshll.u32 %s246_s12, 4  ;;  %s251_s7 = sshll.u32 %s250_s20, 4  ;;  %s254_s11 = int_to_ptr.vmem [resolvable:$true] %s253_s11  ;;  %s252_s7 = int_to_ptr.hbm [resolvable:$true] %s251_s7 }
  0x22   : > { %p616_p4 = pnand %p623_p1, %p983_p3  ;;  %s243_s10 = scalar_lea.sflag [#allocation4], %s242_s13 }
  0x23   : > { %s875_s16 = smov 512   ;;  %s876_s21 = smov 128  }
  0x24   : > { %s877_s25 = smov 8   ;;  %p596_p5 = scmp.ge.s32.totalorder %s873_s8, 1 }
  0x25   : > { %618 = dma.hbm_to_vmem [thread:$0]  (!%p616_p4), %s252_s7, 512, %s254_s11, %s243_s10, %s875_s16, %s876_s21, %s877_s25  }
  0x26   : > { %p282_p6 = scmp.lt.s32.totalorder %s873_s8, 9 }
  0x28   : > { %p283_p7 = pnand %p596_p5, %p282_p6 }
  0x29   : > { %s288_s9 = sand.u32 (!%p283_p7), 1, %s849_s27  }
  0x2a   : > { %286 = sbr.rel (%p283_p7) target bundleno = 237 (0xed), region = 44  ;;  %s597_s18 = sshll.u32 (!%p283_p7), %s288_s9, 5 }
  0x2b   : > { %s289_s14 = scalar_lea.sflag (!%p283_p7), [#allocation4], %s288_s9  ;;  %s292_s12 = scalar_lea.vmem (!%p283_p7), [#allocation3], %s597_s18 }
  0x2f   : > { %824 = dma.done.wait (%p993_p8), %s289_s14, 512  }
  0x30   : > { %826 = vsyncadd (%p993_p8), %s289_s14, 4294966784  ;;  %v355_v0 = vld [vmem:[%s292_s12] sm:$0xff]  ;;  %v356_v1 = vld [vmem:[%s292_s12 + $0x8] sm:$0xff]  ;;  %p338_p3 = scmp.lt.s32.totalorder %s861_s30, 1  ;;  %v878_v16 = vmov 0   ;;  %vm391_vm3 = vcmask 261120   ;;  %v410_v38 = vlaneseq }
  0x31   : > { %v357_v2 = vld [vmem:[%s292_s12 + $0x10] sm:$0xff]  ;;  %v358_v3 = vld [vmem:[%s292_s12 + $0x18] sm:$0xff]  ;;  %v359_v4 = vmul.f32 %v355_v0, %v355_v0  ;;  %v360_v5 = vmul.f32 %v356_v1, %v356_v1  ;;  %717 = vset.pattern.permute.xlu0 %v878_v16  ;;  %718 = vset.pattern.permute.xlu1 %v878_v16  ;;  %s427_s12 = sld [smem:[#allocation2]]  ;;  %s335_s11 = sand.u32 1, %s837_s24  }
  0x32   : > { %v361_v6 = vmul.f32 %v357_v2, %v357_v2  ;;  %v362_v7 = vmul.f32 %v358_v3, %v358_v3  ;;  %s339_s25 = scalar_select %p338_p3, %s861_s30, 1  ;;  %v411_v39 = vand.u32 127, %v410_v38 }
  0x33   : > { %v363_v8 = vadd.f32 %v360_v5, %v359_v4  ;;  %s598_s17 = sshll.u32 %s335_s11, 3 }
  0x34   : > { %s1032_s7 = sshll.u32 %s339_s25, 3  ;;  %s607_s25 = sshll.u32 %s861_s30, 2 }
  0x35   : > { %v364_v9 = vadd.f32 %v363_v8, %v361_v6  ;;  %s349_s16 = scalar_lea.vmem %s1107_s3, %s1032_s7  ;;  %s353_s13 = scalar_lea.vmem %s1108_s4, %s1032_s7 }
  0x36   : > { %v420_v18 = vld [vmem:[%s349_s16] sm:$0xff]  ;;  %s345_s10 = scalar_lea.vmem %s1106_s2, %s1032_s7  ;;  %s341_s14 = scalar_lea.vmem %s1104_s0, %s1032_s7 }
  0x37   : > { %v365_v10 = vadd.f32 %v364_v9, %v362_v7  ;;  %v429_v19 = vld [vmem:[%s353_s13] sm:$0xff]  ;;  %423 = vperm.xlu0 %717, %v420_v18   ;;  %s452_s15 = sadd.s32 %s857_s29, %s607_s25  ;;  %s605_s16 = sshll.u32 %s857_s29, 7  ;;  %v430_v42 = vstv %s427_s12 }
  0x38   : > { %436 = vperm.xlu1 %718, %v429_v19   ;;  %v415_v21 = vld [vmem:[%s345_s10] sm:$0xff]  ;;  %s608_s21 = sshll.u32 %s452_s15, 3  ;;  %v413_v40 = vstv %s605_s16  ;;  %s337_s30 = scalar_lea.vmem [#allocation6], %s598_s17 }
  0x39   : > { %v366_v11 = vrot.slane %v365_v10, 4  ;;  %v389_v35 = vld [vmem:[%s341_s14] sm:$0xff]  ;;  %s454_s19 = scalar_lea.hbm %s1110_s6, %s608_s21  ;;  %v414_v44 = vadd.s32 %v413_v40, %v411_v39  ;;  %s456_s20 = sshll.u32 %s337_s30, 4  ;;  %s457_s20 = int_to_ptr.vmem [resolvable:$true] %s456_s20 }
  0x3a   : > { %v390_v36 = vpack.c.bf16 %v389_v35, %v389_v35  ;;  %s458_s10 = sshll.u32 %s454_s19, 4  ;;  %s442_s29 = scalar_lea.sflag [#allocation5], %s335_s11  ;;  %s459_s10 = int_to_ptr.hbm [resolvable:$true] %s458_s10 }
  0x3b   : > { %v367_v12 = vadd.f32 %v366_v11, %v365_v10  ;;  %s765_s9 = sshra.s32 %s459_s10, 4  ;;  %s771_s25 = scalar_lea.hbm %s1110_s6, 64  ;;  %s766_s9 = int_to_ptr.hbm [resolvable:$true] %s765_s9 }
  0x3c   : > { %s767_s18 = scalar_lea.hbm %s766_s9, 8  ;;  %p772_p11 = scmp.lt.s32.totalorder %s766_s9, %s1110_s6 }
  0x3d   : > { %v368_v13 = vrot.slane %v367_v12, 2  ;;  %p768_p8 = scmp.ne.s32.totalorder %s766_s9, %s767_s18  ;;  %p773_p12 = scmp.lt.s32.totalorder %s771_s25, %s767_s18 }
  0x3f   : > { %v369_v14 = vadd.f32 %v368_v13, %v367_v12  ;;  %417 = vperm.xlu0 %717, %v415_v21   ;;  %p769_p9 = pnand %p768_p8, %p1007_p13  ;;  %p774_p0 = por %p773_p12, %p772_p11 }
  0x41   : > { %v370_v15 = vrot.slane %v369_v14, 1  ;;  %p770_p10 = pneg %p769_p9 }
  0x43   : > { %v371_v17 = vadd.f32 %v370_v15, %v369_v14  ;;  %p775_p1 = pnand %p774_p0, %p770_p10 }
  0x45   : > { %v372_v20 = vmax.f32 %v371_v17, 1e-30 }
  0x47   : > { %719 = vrsqrt.f32 %v372_v20  ;;  %vm379_vm0 = vweird.f32 %v372_v20 }
  0x4d   : > { %v720_v22 = vpop.eup %719 }
  0x4e   : > { %v374_v23 = vmul.f32 %v720_v22, %v372_v20  ;;  %vm380_vm1 = vweird.f32 %v720_v22 }
  0x4f   : > { %vm381_vm2 = vmor %vm379_vm0, %vm380_vm1 }
  0x50   : > { %v375_v24 = vmul.f32 %v720_v22, %v374_v23 }
  0x52   : > { %v376_v25 = vmul.f32 0.5, %v375_v24 }
  0x54   : > { %v377_v26 = vsub.f32 1.5, %v376_v25 }
  0x56   : > { %v378_v27 = vmul.f32 %v720_v22, %v377_v26 }
  0x58   : > { %v382_v28 = vsel %vm381_vm2, %v720_v22, %v378_v27 }
  0x59   : > { %v385_v29 = vmul.f32 %v382_v28, %v357_v2  ;;  %v386_v30 = vmul.f32 %v382_v28, %v358_v3  ;;  %v383_v31 = vmul.f32 %v382_v28, %v355_v0  ;;  %v384_v32 = vmul.f32 %v382_v28, %v356_v1 }
  0x5b   : > { %v388_v33 = vpack.c.bf16 %v386_v30, %v385_v29  ;;  %v387_v34 = vpack.c.bf16 %v384_v32, %v383_v31 }
  0x5d   : > { %401 = vmatpush.bf16.msra.mxu0 %v388_v33 }
  0x61   : > { %402 = vmatpush.bf16.msra.mxu0 %v387_v34 }
  0x64   : > { %603 = vmatmul.msk.bf16.vlgmr.msra.gmra.mxu0 %vm391_vm3, %v390_v36 }
  0xa9   : > { %v424_v37 = vpop.permute.xlu0 %423 }
  0xaa   : > { %v437_v49 = vpop.permute.xlu1 %436 }
  0xb1   : > { %v418_v47 = vpop.permute.xlu0 %417 }
  0xb2   : > { %vm419_vm5 = vcmp.eq.s32.totalorder %v414_v44, %v418_v47 }
  0xe1   : > { %v404_v41 = vpop.f32.mrf.mxu0 }
  0xe2   : > { %v604_v43 = vclamps-f32 %v404_v41, 1.0 }
  0xe4   : > { %v428_v45 = vmul.f32 64.0, %v604_v43  ;;  %v431_v46 = vadd.f32 %v604_v43, %v430_v42  ;;  %vm426_vm4 = vcmp.gt.f32.partialorder %v604_v43, %v424_v37 }
  0xe6   : > { %v432_v48 = vmul.f32 %v431_v46, %v428_v45 }
  0xe8   : > { %v433_v50 = vsel %vm426_vm4, %v432_v48, %v428_v45 }
  0xe9   : > { %v439_v51 = vsel %vm419_vm5, %v437_v49, %v433_v50  ;;  %v406_v52 = vpop.f32.mrf.mxu0 }
  0xea   : > { %440 = vst [vmem:[%s337_s30] sm:$0xff] %v439_v51 }
  0xeb   : > { %778 = shalt.err (!%p775_p1)
}
  0xec   : > { %613 = dma.vmem_to_hbm [thread:$0]  (%p1007_p13), %s457_s20, 128, %s459_s10, %s442_s29  }
  0xed PF: > { %p624_p4 = scmp.ge.s32.totalorder %s873_s8, 2  ;;  %s470_s11 = sand.u32 1, %s833_s23  }
  0xee   : > { %s471_s17 = scalar_lea.sflag [#allocation5], %s470_s11 }
  0xef   : > { %p620_p5 = pnand %p624_p4, %p1012_p2 }
  0xf1   : > { %p621_p6 = pneg %p620_p5 }
  0xf3   : > { %828 = dma.done.wait (%p621_p6), %s471_s17, 128  }
  0xf4   : > { %830 = vsyncadd (%p621_p6), %s471_s17, 4294967168  ;;  %s23_s8 = sadd.s32 1, %s873_s8   ;;  %s1125_s21 = sld [smem:[#allocation9_spill]] }
  0xf5   : > { %p20_p7 = scmp.ge.s32.totalorder %s23_s8, 10   ;;  %s1126_s25 = sld [smem:[#allocation14_spill]] }
  0xf6   : > { %s1127_s22 = sld [smem:[#allocation13_spill]]  ;;  %s1131_s23 = smov %s837_s24 }
  0xf7   : > { %s1128_s30 = sld [smem:[#allocation10_spill]]  ;;  %s1133_s26 = smov %s849_s27 }
  0xf8   : > { %s1129_s7 = sld [smem:[#allocation11_spill]]  ;;  %s1134_s27 = smov %s853_s28 }
  0xf9   : > { %s1130_s13 = sld [smem:[#allocation12_spill]]  ;;  %s1136_s29 = smov %s865_s5 }
  0xfa   : > { %s1132_s24 = smov %s1125_s21 }
  0xfb   :  { %22 = sbr.rel (!%p20_p7) target bundleno = 11 (0xb), region = 101 }
  0xfc   : > { %s1135_s28 = smov %s1127_s22 }
  0xfe   : > { %s1137_s5 = smov %s1129_s7 }
  0xff   : > { %s1138_s7 = smov %s1130_s13 }
 0x100   :  { %477 = vsyncpa [#allocation4], 1 }
 0x101   :  { %479 = vsyncpa [#allocation4 + $0x1], 1 }
 0x102   :  { %480 = vsyncpa [#allocation5], 1 }
 0x103   :  { %482 = vsyncpa [#allocation5 + $0x1], 1 }

</bundles_post_ra>
